<compile_context>
chip_gen: v7x
topology: tpu7x:2x2x1
jax: 0.10.0
libtpu: 0.0.40
codegen_flags: <defaults>
</compile_context>

<pallas_src>
import jax
import jax.numpy as jnp
from jax.experimental import pallas as pl
from jax.experimental.pallas import tpu as pltpu


# ---------------------------------------------------------------------------
# Kernel: two low-rank GEMM chains + one concatenated, lane-dense output tile.
# ---------------------------------------------------------------------------
def _coattention_kernel(
    x_ref, p_ref,
    wvx_ref, bvx_ref, wfcx_ref, bfcx_ref,
    wvp_ref, bvp_ref, wfcp_ref, bfcp_ref,
    fused_ref,
):
    drug_dim = wfcx_ref.shape[1]

    # attended_x = fc_x( softmax(singleton) * V_x(x) ) == fc_x(V_x(x))
    v_x = (
        jnp.dot(x_ref[...], wvx_ref[...], preferred_element_type=jnp.float32)
        + bvx_ref[...]
    )
    attended_x = (
        jnp.dot(v_x, wfcx_ref[...], preferred_element_type=jnp.float32)
        + bfcx_ref[...]
    )

    # attended_p = fc_p( softmax(singleton) * V_p(p) ) == fc_p(V_p(p))
    v_p = (
        jnp.dot(p_ref[...], wvp_ref[...], preferred_element_type=jnp.float32)
        + bvp_ref[...]
    )
    attended_p = (
        jnp.dot(v_p, wfcp_ref[...], preferred_element_type=jnp.float32)
        + bfcp_ref[...]
    )

    # fused = cat([attended_x, attended_p], axis=1); column offsets are multiples
    # of 128 at the module's dims -> unmasked, lane-aligned stores.
    fused_ref[:, :drug_dim] = attended_x.astype(fused_ref.dtype)
    fused_ref[:, drug_dim:] = attended_p.astype(fused_ref.dtype)


def _round_up(v, m):
    return ((v + m - 1) // m) * m


# ---------------------------------------------------------------------------
# Wrapper: tile over batch, weights VMEM-resident, single fused output.
# ---------------------------------------------------------------------------
def co_attention(x, p, params, *, batch_tile=1024):
    """Pallas-backed CoAttention forward.

    Returns the fused features [B, drug_dim + protein_dim], identical in
    semantics to the PyTorch module (whose singleton softmax is exactly 1).
    """
    B, drug_dim = x.shape
    protein_dim = p.shape[1]
    k = params["w_v_x"].shape[1]
    fused_dim = drug_dim + protein_dim

    # Lane-dense concat requires 128-aligned column offsets (true for the module's
    # real dims: drug_dim=256, protein_dim=128).
    assert drug_dim % 128 == 0, "drug_dim must be a multiple of 128 (pad upstream)"
    assert protein_dim % 128 == 0, "protein_dim must be a multiple of 128 (pad upstream)"

    # Tile sizing: multiple of 8, large enough to amortize per-step overhead, and
    # capped at ~half the batch so v7x's two TensorCores both get grid steps.
    tile_b = min(batch_tile, max(8, _round_up(pl.cdiv(B, 2), 8)))
    tile_b = min(tile_b, _round_up(B, 8))
    grid = (pl.cdiv(B, tile_b),)

    const = lambda i: (0, 0)     # weights/biases stay VMEM-resident
    batched = lambda i: (i, 0)   # activations / output tile over batch

    fused = pl.pallas_call(
        _coattention_kernel,
        out_shape=jax.ShapeDtypeStruct((B, fused_dim), x.dtype),
        grid_spec=pltpu.PrefetchScalarGridSpec(
            num_scalar_prefetch=0,
            grid=grid,
            in_specs=[
                pl.BlockSpec((tile_b, drug_dim), batched),      # x
                pl.BlockSpec((tile_b, protein_dim), batched),   # p
                pl.BlockSpec((drug_dim, k), const),             # W_v_x
                pl.BlockSpec((1, k), const),                    # b_v_x
                pl.BlockSpec((k, drug_dim), const),             # W_fc_x
                pl.BlockSpec((1, drug_dim), const),             # b_fc_x
                pl.BlockSpec((protein_dim, k), const),          # W_v_p
                pl.BlockSpec((1, k), const),                    # b_v_p
                pl.BlockSpec((k, protein_dim), const),          # W_fc_p
                pl.BlockSpec((1, protein_dim), const),          # b_fc_p
            ],
            out_specs=pl.BlockSpec((tile_b, fused_dim), batched),
        ),
        compiler_params=pltpu.CompilerParams(
            dimension_semantics=("parallel",),
        ),
    )(
        x, p,
        params["w_v_x"], params["b_v_x"], params["w_fc_x"], params["b_fc_x"],
        params["w_v_p"], params["b_v_p"], params["w_fc_p"], params["b_fc_p"],
    )

    return fused


# ---------------------------------------------------------------------------
# Parameter init mirroring the PyTorch module (weights stored [in, out]).
# ---------------------------------------------------------------------------
def init_params(key, drug_dim, protein_dim, k=64, dtype=jnp.float32):
    names_dims = [
        ("q_x", drug_dim, k), ("k_p", protein_dim, k), ("v_p", protein_dim, k),
        ("q_p", protein_dim, k), ("k_x", drug_dim, k), ("v_x", drug_dim, k),
        ("fc_x", k, drug_dim), ("fc_p", k, protein_dim),
    ]
    keys = jax.random.split(key, 2 * len(names_dims))
    params = {}
    for i, (name, fan_in, fan_out) in enumerate(names_dims):
        w_key, b_key = keys[2 * i], keys[2 * i + 1]
        std = (2.0 / (fan_in + fan_out)) ** 0.5          # xavier_normal_
        params[f"w_{name}"] = std * jax.random.normal(w_key, (fan_in, fan_out), dtype)
        bound = 1.0 / (fan_in ** 0.5)                    # default nn.Linear bias init
        params[f"b_{name}"] = jax.random.uniform(
            b_key, (1, fan_out), dtype, minval=-bound, maxval=bound)
    return params


# ---------------------------------------------------------------------------
# Pure-JAX reference mirroring the PyTorch forward exactly (incl. dead Q/K path).
# ---------------------------------------------------------------------------
def co_attention_ref(x, p, params, k=64):
    def lin(inp, w, b):
        return inp @ w + b

    q_x = lin(x, params["w_q_x"], params["b_q_x"])
    k_p = lin(p, params["w_k_p"], params["b_k_p"])
    v_p = lin(p, params["w_v_p"], params["b_v_p"])
    scores_x = jnp.einsum("bk,bk->b", q_x, k_p)[:, None, None] / (k ** 0.5)  # [B,1,1]
    alpha_x = jax.nn.softmax(scores_x, axis=-1)
    attended_p = (alpha_x * v_p[:, None, :])[:, 0, :]
    attended_p = lin(attended_p, params["w_fc_p"], params["b_fc_p"])

    q_p = lin(p, params["w_q_p"], params["b_q_p"])
    k_x = lin(x, params["w_k_x"], params["b_k_x"])
    v_x = lin(x, params["w_v_x"], params["b_v_x"])
    scores_p = jnp.einsum("bk,bk->b", q_p, k_x)[:, None, None] / (k ** 0.5)
    alpha_p = jax.nn.softmax(scores_p, axis=-1)
    attended_x = (alpha_p * v_x[:, None, :])[:, 0, :]
    attended_x = lin(attended_x, params["w_fc_x"], params["b_fc_x"])

    return jnp.concatenate([attended_x, attended_p], axis=1)


if __name__ == "__main__":
    # Shapes consistent with MMGF_GCN: output_dim=128 -> drug_dim = 256,
    # protein_dim = 128, k = 64; small batch for the demo.
    B, drug_dim, protein_dim, k = 8, 256, 128, 64

    key = jax.random.PRNGKey(0)
    kx, kp, kparams = jax.random.split(key, 3)
    x = jax.random.normal(kx, (B, drug_dim), jnp.float32)
    p = jax.random.normal(kp, (B, protein_dim), jnp.float32)
    params = init_params(kparams, drug_dim, protein_dim, k)

    fused = jax.block_until_ready(co_attention(x, p, params))
    assert fused.shape == (B, drug_dim + protein_dim), fused.shape

    ref = jax.block_until_ready(co_attention_ref(x, p, params, k))
    # Tolerance covers MXU vs XLA accumulation-order differences only (no weight
    # refactoring is done anymore).
    assert jnp.allclose(fused, ref, atol=1e-4, rtol=1e-4), (
        float(jnp.max(jnp.abs(fused - ref))))

    print("KERNEL_OK")
</pallas_src>

<mosaic_0001>
module attributes {stable_mosaic.version = 11 : i64} {
  func.func @_coattention_kernel(%arg0: i32, %arg1: memref<8x256xf32, #tpu.memory_space<vmem>>, %arg2: memref<8x128xf32, #tpu.memory_space<vmem>>, %arg3: memref<256x64xf32, #tpu.memory_space<vmem>>, %arg4: memref<1x64xf32, #tpu.memory_space<vmem>>, %arg5: memref<64x256xf32, #tpu.memory_space<vmem>>, %arg6: memref<1x256xf32, #tpu.memory_space<vmem>>, %arg7: memref<128x64xf32, #tpu.memory_space<vmem>>, %arg8: memref<1x64xf32, #tpu.memory_space<vmem>>, %arg9: memref<64x128xf32, #tpu.memory_space<vmem>>, %arg10: memref<1x128xf32, #tpu.memory_space<vmem>>, %arg11: memref<8x384xf32, #tpu.memory_space<vmem>>) attributes {dimension_semantics = [#tpu.dimension_semantics<parallel>], iteration_bounds = array<i64: 1>, scalar_prefetch = 0 : i64, scratch_operands = 0 : i64, tpu.core_type = #tpu.core_type<tc>, window_params = [{transform_indices = @transform_0, window_bounds = array<i64: 8, 256>}, {transform_indices = @transform_1, window_bounds = array<i64: 8, 128>}, {pipeline_mode = #tpu.pipeline_mode<synchronous>, transform_indices = @transform_2, window_bounds = array<i64: 256, 64>}, {pipeline_mode = #tpu.pipeline_mode<synchronous>, transform_indices = @transform_3, window_bounds = array<i64: 1, 64>}, {pipeline_mode = #tpu.pipeline_mode<synchronous>, transform_indices = @transform_4, window_bounds = array<i64: 64, 256>}, {pipeline_mode = #tpu.pipeline_mode<synchronous>, transform_indices = @transform_5, window_bounds = array<i64: 1, 256>}, {pipeline_mode = #tpu.pipeline_mode<synchronous>, transform_indices = @transform_6, window_bounds = array<i64: 128, 64>}, {pipeline_mode = #tpu.pipeline_mode<synchronous>, transform_indices = @transform_7, window_bounds = array<i64: 1, 64>}, {pipeline_mode = #tpu.pipeline_mode<synchronous>, transform_indices = @transform_8, window_bounds = array<i64: 64, 128>}, {pipeline_mode = #tpu.pipeline_mode<synchronous>, transform_indices = @transform_9, window_bounds = array<i64: 1, 128>}, {transform_indices = @transform_10, window_bounds = array<i64: 8, 384>}]} {
    %c0 = arith.constant 0 : index
    %c0_0 = arith.constant 0 : index
    %0 = vector.load %arg1[%c0, %c0_0] : memref<8x256xf32, #tpu.memory_space<vmem>>, vector<8x256xf32>
    %c0_1 = arith.constant 0 : index
    %c0_2 = arith.constant 0 : index
    %1 = vector.load %arg3[%c0_1, %c0_2] : memref<256x64xf32, #tpu.memory_space<vmem>>, vector<256x64xf32>
    %cst = arith.constant dense<0.000000e+00> : vector<8x64xf32>
    %2 = tpu.matmul %0, %1, %cst {dimension_numbers = #tpu.dot_dimension_numbers<[1], [0], [0], [1], [0, 0, 1, 1], [], []>} : vector<8x256xf32>, vector<256x64xf32>, vector<8x64xf32> -> vector<8x64xf32>
    %c0_3 = arith.constant 0 : index
    %c0_4 = arith.constant 0 : index
    %3 = vector.load %arg4[%c0_3, %c0_4] : memref<1x64xf32, #tpu.memory_space<vmem>>, vector<1x64xf32>
    %4 = vector.broadcast %3 : vector<1x64xf32> to vector<8x64xf32>
    %5 = arith.addf %2, %4 : vector<8x64xf32>
    %c0_5 = arith.constant 0 : index
    %c0_6 = arith.constant 0 : index
    %6 = vector.load %arg5[%c0_5, %c0_6] : memref<64x256xf32, #tpu.memory_space<vmem>>, vector<64x256xf32>
    %cst_7 = arith.constant dense<0.000000e+00> : vector<8x256xf32>
    %7 = tpu.matmul %5, %6, %cst_7 {dimension_numbers = #tpu.dot_dimension_numbers<[1], [0], [0], [1], [0, 0, 1, 1], [], []>} : vector<8x64xf32>, vector<64x256xf32>, vector<8x256xf32> -> vector<8x256xf32>
    %c0_8 = arith.constant 0 : index
    %c0_9 = arith.constant 0 : index
    %8 = vector.load %arg6[%c0_8, %c0_9] : memref<1x256xf32, #tpu.memory_space<vmem>>, vector<1x256xf32>
    %9 = vector.broadcast %8 : vector<1x256xf32> to vector<8x256xf32>
    %10 = arith.addf %7, %9 : vector<8x256xf32>
    %c0_10 = arith.constant 0 : index
    %c0_11 = arith.constant 0 : index
    %11 = vector.load %arg2[%c0_10, %c0_11] : memref<8x128xf32, #tpu.memory_space<vmem>>, vector<8x128xf32>
    %c0_12 = arith.constant 0 : index
    %c0_13 = arith.constant 0 : index
    %12 = vector.load %arg7[%c0_12, %c0_13] : memref<128x64xf32, #tpu.memory_space<vmem>>, vector<128x64xf32>
    %cst_14 = arith.constant dense<0.000000e+00> : vector<8x64xf32>
    %13 = tpu.matmul %11, %12, %cst_14 {dimension_numbers = #tpu.dot_dimension_numbers<[1], [0], [0], [1], [0, 0, 1, 1], [], []>} : vector<8x128xf32>, vector<128x64xf32>, vector<8x64xf32> -> vector<8x64xf32>
    %c0_15 = arith.constant 0 : index
    %c0_16 = arith.constant 0 : index
    %14 = vector.load %arg8[%c0_15, %c0_16] : memref<1x64xf32, #tpu.memory_space<vmem>>, vector<1x64xf32>
    %15 = vector.broadcast %14 : vector<1x64xf32> to vector<8x64xf32>
    %16 = arith.addf %13, %15 : vector<8x64xf32>
    %c0_17 = arith.constant 0 : index
    %c0_18 = arith.constant 0 : index
    %17 = vector.load %arg9[%c0_17, %c0_18] : memref<64x128xf32, #tpu.memory_space<vmem>>, vector<64x128xf32>
    %cst_19 = arith.constant dense<0.000000e+00> : vector<8x128xf32>
    %18 = tpu.matmul %16, %17, %cst_19 {dimension_numbers = #tpu.dot_dimension_numbers<[1], [0], [0], [1], [0, 0, 1, 1], [], []>} : vector<8x64xf32>, vector<64x128xf32>, vector<8x128xf32> -> vector<8x128xf32>
    %c0_20 = arith.constant 0 : index
    %c0_21 = arith.constant 0 : index
    %19 = vector.load %arg10[%c0_20, %c0_21] : memref<1x128xf32, #tpu.memory_space<vmem>>, vector<1x128xf32>
    %20 = vector.broadcast %19 : vector<1x128xf32> to vector<8x128xf32>
    %21 = arith.addf %18, %20 : vector<8x128xf32>
    %c0_22 = arith.constant 0 : index
    %c0_23 = arith.constant 0 : index
    %22 = vector.load %arg11[%c0_22, %c0_23] : memref<8x384xf32, #tpu.memory_space<vmem>>, vector<8x256xf32>
    tpu.vector_store %arg11[%c0_22, %c0_23], %10 {strides = array<i32>} : memref<8x384xf32, #tpu.memory_space<vmem>>, vector<8x256xf32>,
    %c0_24 = arith.constant 0 : index
    %c256 = arith.constant 256 : index
    %23 = vector.load %arg11[%c0_24, %c256] : memref<8x384xf32, #tpu.memory_space<vmem>>, vector<8x128xf32>
    tpu.vector_store %arg11[%c0_24, %c256], %21 {strides = array<i32>} : memref<8x384xf32, #tpu.memory_space<vmem>>, vector<8x128xf32>,
    return
  }
  func.func @transform_0(%arg0: i32) -> (i32, i32) {
    %c0_i32 = arith.constant 0 : i32
    %c0_i32_0 = arith.constant 0 : i32
    return %arg0, %c0_i32 : i32, i32
  }
  func.func @transform_1(%arg0: i32) -> (i32, i32) {
    %c0_i32 = arith.constant 0 : i32
    %c0_i32_0 = arith.constant 0 : i32
    return %arg0, %c0_i32 : i32, i32
  }
  func.func @transform_2(%arg0: i32) -> (i32, i32) {
    %c0_i32 = arith.constant 0 : i32
    %c0_i32_0 = arith.constant 0 : i32
    %c0_i32_1 = arith.constant 0 : i32
    return %c0_i32, %c0_i32_0 : i32, i32
  }
  func.func @transform_3(%arg0: i32) -> (i32, i32) {
    %c0_i32 = arith.constant 0 : i32
    %c0_i32_0 = arith.constant 0 : i32
    %c0_i32_1 = arith.constant 0 : i32
    return %c0_i32, %c0_i32_0 : i32, i32
  }
  func.func @transform_4(%arg0: i32) -> (i32, i32) {
    %c0_i32 = arith.constant 0 : i32
    %c0_i32_0 = arith.constant 0 : i32
    %c0_i32_1 = arith.constant 0 : i32
    return %c0_i32, %c0_i32_0 : i32, i32
  }
  func.func @transform_5(%arg0: i32) -> (i32, i32) {
    %c0_i32 = arith.constant 0 : i32
    %c0_i32_0 = arith.constant 0 : i32
    %c0_i32_1 = arith.constant 0 : i32
    return %c0_i32, %c0_i32_0 : i32, i32
  }
  func.func @transform_6(%arg0: i32) -> (i32, i32) {
    %c0_i32 = arith.constant 0 : i32
    %c0_i32_0 = arith.constant 0 : i32
    %c0_i32_1 = arith.constant 0 : i32
    return %c0_i32, %c0_i32_0 : i32, i32
  }
  func.func @transform_7(%arg0: i32) -> (i32, i32) {
    %c0_i32 = arith.constant 0 : i32
    %c0_i32_0 = arith.constant 0 : i32
    %c0_i32_1 = arith.constant 0 : i32
    return %c0_i32, %c0_i32_0 : i32, i32
  }
  func.func @transform_8(%arg0: i32) -> (i32, i32) {
    %c0_i32 = arith.constant 0 : i32
    %c0_i32_0 = arith.constant 0 : i32
    %c0_i32_1 = arith.constant 0 : i32
    return %c0_i32, %c0_i32_0 : i32, i32
  }
  func.func @transform_9(%arg0: i32) -> (i32, i32) {
    %c0_i32 = arith.constant 0 : i32
    %c0_i32_0 = arith.constant 0 : i32
    %c0_i32_1 = arith.constant 0 : i32
    return %c0_i32, %c0_i32_0 : i32, i32
  }
  func.func @transform_10(%arg0: i32) -> (i32, i32) {
    %c0_i32 = arith.constant 0 : i32
    %c0_i32_0 = arith.constant 0 : i32
    return %arg0, %c0_i32 : i32, i32
  }
}

</mosaic_0001>

<bundles_post_ra>
// kernel: tpu_custom_call.1
= control target key start
LH: loop header
LB: loop body
LE: loop exit
PB: predicated region body
PF: predicated region fallthrough
CT: control target
= control target key end

     0   :  { %s1005_s0 = inlined_call_operand.vmem [shape: f32[8,256], index: 0, kind: input, shape index: {}]   ;;  %s1006_s1 = inlined_call_operand.vmem [shape: f32[8,128], index: 1, kind: input, shape index: {}]   ;;  %s1007_s2 = inlined_call_operand.vmem [shape: f32[256,64], index: 2, kind: input, shape index: {}]   ;;  %s1008_s3 = inlined_call_operand.vmem [shape: f32[1,64], index: 3, kind: input, shape index: {}]   ;;  %s1009_s4 = inlined_call_operand.vmem [shape: f32[64,256], index: 4, kind: input, shape index: {}]   ;;  %s1010_s5 = inlined_call_operand.vmem [shape: f32[1,256], index: 5, kind: input, shape index: {}]   ;;  %s1011_s6 = inlined_call_operand.vmem [shape: f32[128,64], index: 6, kind: input, shape index: {}]   ;;  %s1012_s7 = inlined_call_operand.vmem [shape: f32[1,64], index: 7, kind: input, shape index: {}]   ;;  %s1013_s8 = inlined_call_operand.vmem [shape: f32[64,128], index: 8, kind: input, shape index: {}]   ;;  %s1014_s9 = inlined_call_operand.vmem [shape: f32[1,128], index: 9, kind: input, shape index: {}]   ;;  %s1015_s10 = inlined_call_operand.hbm [shape: f32[8,384], index: 10, kind: output, shape index: {}]  }
   0x1   :  { %v54_v0 = vld [vmem:[%s1007_s2 + $0x80] sm:$0xff]  ;;  %v55_v1 = vld [vmem:[%s1007_s2 + $0x88] sm:$0xff]  ;;  %v56_v5 = vld [vmem:[%s1007_s2 + $0x90] sm:$0xff] }
   0x2   :  { %v38_v2 = vld [vmem:[%s1007_s2] sm:$0xff]  ;;  %v569_v3 = vpack.c.bf16 %v55_v1, %v54_v0  ;;  %v39_v4 = vld [vmem:[%s1007_s2 + $0x8] sm:$0xff]  ;;  %v57_v6 = vld [vmem:[%s1007_s2 + $0x98] sm:$0xff] }
   0x3   :  { %v571_v7 = vpack.c.bf16 %v39_v4, %v38_v2  ;;  %v573_v8 = vpack.c.bf16 %v57_v6, %v56_v5  ;;  %v40_v9 = vld [vmem:[%s1007_s2 + $0x10] sm:$0xff]  ;;  %v41_v10 = vld [vmem:[%s1007_s2 + $0x18] sm:$0xff]  ;;  %v58_v11 = vld [vmem:[%s1007_s2 + $0xa0] sm:$0xff] }
   0x4   :  { %570 = vmatprep.subr.bf16.mxu0 %v569_v3  ;;  %v59_v12 = vld [vmem:[%s1007_s2 + $0xa8] sm:$0xff]  ;;  %v575_v13 = vpack.c.bf16 %v41_v10, %v40_v9  ;;  %v42_v15 = vld [vmem:[%s1007_s2 + $0x20] sm:$0xff]  ;;  %v60_v17 = vld [vmem:[%s1007_s2 + $0xb0] sm:$0xff] }
   0x5   :  { %572 = vmatpush3.bf16.msra.mxu0 %v571_v7  ;;  %v577_v14 = vpack.c.bf16 %v59_v12, %v58_v11  ;;  %v43_v16 = vld [vmem:[%s1007_s2 + $0x28] sm:$0xff]  ;;  %v61_v18 = vld [vmem:[%s1007_s2 + $0xb8] sm:$0xff]  ;;  %v44_v21 = vld [vmem:[%s1007_s2 + $0x30] sm:$0xff] }
   0x6   :  { %574 = vmatprep.subr.bf16.mxu0 %v573_v8  ;;  %v579_v19 = vpack.c.bf16 %v43_v16, %v42_v15  ;;  %v581_v20 = vpack.c.bf16 %v61_v18, %v60_v17  ;;  %v45_v22 = vld [vmem:[%s1007_s2 + $0x38] sm:$0xff]  ;;  %v62_v23 = vld [vmem:[%s1007_s2 + $0xc0] sm:$0xff]  ;;  %v63_v24 = vld [vmem:[%s1007_s2 + $0xc8] sm:$0xff] }
   0x7   :  { %v37_v25 = vld [vmem:[%s1005_s0 + $0x8] sm:$0xff]  ;;  %v46_v26 = vld [vmem:[%s1007_s2 + $0x40] sm:$0xff]  ;;  %v150_v29 = vld [vmem:[%s1009_s4 + $0x18] sm:$0xff]  ;;  %v583_v30 = vpack.c.bf16 %v45_v22, %v44_v21  ;;  %v585_v36 = vpack.c.bf16 %v63_v24, %v62_v23 }
   0x8   :  { %v47_v27 = vld [vmem:[%s1007_s2 + $0x48] sm:$0xff]  ;;  %141 = vmatprep.mubr.f32.mxu0 %v37_v25  ;;  %v64_v31 = vld [vmem:[%s1007_s2 + $0xd0] sm:$0xff]  ;;  %v147_v33 = vld [vmem:[%s1009_s4] sm:$0xff] }
   0x9   :  { %576 = vmatpush3.bf16.msra.mxu0 %v575_v13  ;;  %v148_v28 = vld [vmem:[%s1009_s4 + $0x8] sm:$0xff]  ;;  %v149_v34 = vld [vmem:[%s1009_s4 + $0x10] sm:$0xff]  ;;  %v154_v38 = vld [vmem:[%s1009_s4 + $0x38] sm:$0xff] }
   0xa   :  { %578 = vmatprep.subr.bf16.mxu0 %v577_v14  ;;  %v601_v32 = vpack.c.bf16 %v150_v29, %v148_v28  ;;  %v152_v35 = vld [vmem:[%s1009_s4 + $0x28] sm:$0xff]  ;;  %v603_v37 = vpack.c.bf16 %v149_v34, %v147_v33  ;;  %v151_v39 = vld [vmem:[%s1009_s4 + $0x20] sm:$0xff]  ;;  %v153_v40 = vld [vmem:[%s1009_s4 + $0x30] sm:$0xff] }
   0xb   :  { %v65_v41 = vld [vmem:[%s1007_s2 + $0xd8] sm:$0xff]  ;;  %v605_v42 = vpack.c.bf16 %v154_v38, %v152_v35  ;;  %v156_v43 = vld [vmem:[%s1009_s4 + $0x48] sm:$0xff]  ;;  %v607_v45 = vpack.c.bf16 %v153_v40, %v151_v39 }
   0xc   :  { %602 = vmatprep.subr.bf16.mxu1 %v601_v32  ;;  %v158_v44 = vld [vmem:[%s1009_s4 + $0x58] sm:$0xff] }
   0xd   :  { %580 = vmatpush3.bf16.msra.mxu0 %v579_v19  ;;  %604 = vmatpush1.bf16.msra.mxu1 %v603_v37 }
   0xe   :  { %582 = vmatprep.subr.bf16.mxu0 %v581_v20 }
   0xf   :  { %15 = vsyncpa [#allocation3], 0  ;;  %v587_v46 = vpack.c.bf16 %v47_v27, %v46_v26  ;;  %606 = vmatprep.subr.bf16.mxu1 %v605_v42  ;;  %v609_v47 = vpack.c.bf16 %v158_v44, %v156_v43  ;;  %v155_v48 = vld [vmem:[%s1009_s4 + $0x40] sm:$0xff]  ;;  %v157_v49 = vld [vmem:[%s1009_s4 + $0x50] sm:$0xff]  ;;  %v589_v50 = vpack.c.bf16 %v65_v41, %v64_v31  ;;  %v681_v10 = vmov 0.0   ;;  %s684_s16 = smov [#allocation2]  }
  0x10   :  { %v48_v51 = vld [vmem:[%s1007_s2 + $0x50] sm:$0xff]  ;;  %v49_v52 = vld [vmem:[%s1007_s2 + $0x58] sm:$0xff]  ;;  %v66_v53 = vld [vmem:[%s1007_s2 + $0xe0] sm:$0xff]  ;;  %v611_v55 = vpack.c.bf16 %v157_v49, %v155_v48  ;;  %243 = vmatprep.mubr.f32.mxu1 %v681_v10  ;;  %v682_v11 = vmov 0.0|0.0   ;;  %vm683_vm0 = vmmov 0   ;;  %vm175_vm1 = vcmask 523264  }
  0x11   :  { %584 = vmatpush3.bf16.msra.mxu0 %v583_v30  ;;  %v67_v54 = vld [vmem:[%s1007_s2 + $0xe8] sm:$0xff]  ;;  %608 = vmatpush1.bf16.msra.mxu1 %v607_v45  ;;  %v591_v56 = vpack.c.bf16 %v49_v52, %v48_v51  ;;  %v50_v58 = vld [vmem:[%s1007_s2 + $0x60] sm:$0xff]  ;;  %v68_v60 = vld [vmem:[%s1007_s2 + $0xf0] sm:$0xff]  ;;  %s441_s17 = sshll.u32 %s684_s16, 4  ;;  %s442_s17 = int_to_ptr.vmem [resolvable:$true] %s441_s17 }
  0x12   :  { %586 = vmatprep.subr.bf16.mxu0 %v585_v36  ;;  %610 = vmatprep.subr.bf16.mxu1 %v609_v47  ;;  %v593_v57 = vpack.c.bf16 %v67_v54, %v66_v53  ;;  %v51_v59 = vld [vmem:[%s1007_s2 + $0x68] sm:$0xff]  ;;  %v69_v61 = vld [vmem:[%s1007_s2 + $0xf8] sm:$0xff]  ;;  %v52_v0 = vld [vmem:[%s1007_s2 + $0x70] sm:$0xff]  ;;  %v165_v54 = vlaneseq  ;;  %s657_s18 = scalar_lea.vmem %s442_s17, 384  ;;  %p662_p1 = scmp.lt.s32.totalorder %s442_s17, %s442_s17 }
  0x13   :  { %v595_v62 = vpack.c.bf16 %v51_v59, %v50_v58  ;;  %v597_v63 = vpack.c.bf16 %v69_v61, %v68_v60  ;;  %v53_v1 = vld [vmem:[%s1007_s2 + $0x78] sm:$0xff]  ;;  %v36_v3 = vld [vmem:[%s1005_s0] sm:$0xff]  ;;  %v160_v4 = vld [vmem:[%s1009_s4 + $0x68] sm:$0xff]  ;;  %p658_p0 = scmp.ne.s32.totalorder %s442_s17, %s657_s18  ;;  %p663_p2 = scmp.lt.s32.totalorder %s657_s18, %s657_s18 }
  0x14   :  { %v599_v2 = vpack.c.bf16 %v53_v1, %v52_v0  ;;  %v162_v5 = vld [vmem:[%s1009_s4 + $0x78] sm:$0xff]  ;;  %v159_v7 = vld [vmem:[%s1009_s4 + $0x60] sm:$0xff]  ;;  %v161_v8 = vld [vmem:[%s1009_s4 + $0x70] sm:$0xff] }
  0x15   :  { %588 = vmatpush3.bf16.msra.mxu0 %v587_v46  ;;  %612 = vmatpush1.bf16.msra.mxu1 %v611_v55  ;;  %v613_v6 = vpack.c.bf16 %v162_v5, %v160_v4  ;;  %v615_v9 = vpack.c.bf16 %v161_v8, %v159_v7  ;;  %v251_v13 = vld [vmem:[%s1011_s6] sm:$0xff]  ;;  %v252_v14 = vld [vmem:[%s1011_s6 + $0x8] sm:$0xff]  ;;  %v253_v20 = vld [vmem:[%s1011_s6 + $0x10] sm:$0xff]  ;;  %v166_v55 = vshrl.u32 %v165_v54, 7  ;;  %p664_p3 = por %p663_p2, %p662_p1 }
  0x16   :  { %590 = vmatprep.subr.bf16.mxu0 %v589_v50  ;;  %v449_v15 = vld [vmem:[%s1008_s3] ss:$0 sm:$0xff]  ;;  %v618_v18 = vpack.c.bf16 %v252_v14, %v251_v13  ;;  %v254_v21 = vld [vmem:[%s1011_s6 + $0x18] sm:$0xff]  ;;  %v256_v24 = vld [vmem:[%s1011_s6 + $0x28] sm:$0xff] }
  0x17   :  { %614 = vmatprep.subr.bf16.mxu1 %v613_v6  ;;  %v621_v22 = vpack.c.bf16 %v254_v21, %v253_v20  ;;  %v255_v23 = vld [vmem:[%s1011_s6 + $0x20] sm:$0xff]  ;;  %v257_v26 = vld [vmem:[%s1011_s6 + $0x30] sm:$0xff]  ;;  %v258_v27 = vld [vmem:[%s1011_s6 + $0x38] sm:$0xff]  ;;  %v171_v58 = vsub.s32 1, %v166_v55  ;;  %p665_p4 = pnand %p664_p3, %p658_p0 }
  0x18   :  { %v624_v25 = vpack.c.bf16 %v256_v24, %v255_v23  ;;  %v627_v28 = vpack.c.bf16 %v258_v27, %v257_v26  ;;  %v259_v29 = vld [vmem:[%s1011_s6 + $0x40] sm:$0xff]  ;;  %v260_v30 = vld [vmem:[%s1011_s6 + $0x48] sm:$0xff]  ;;  %v261_v32 = vld [vmem:[%s1011_s6 + $0x50] sm:$0xff] }
  0x19   :  { %592 = vmatpush3.bf16.msra.mxu0 %v591_v56  ;;  %616 = vmatpush1.bf16.msra.mxu1 %v615_v9  ;;  %v630_v31 = vpack.c.bf16 %v260_v30, %v259_v29  ;;  %v262_v33 = vld [vmem:[%s1011_s6 + $0x58] sm:$0xff]  ;;  %v263_v35 = vld [vmem:[%s1011_s6 + $0x60] sm:$0xff]  ;;  %v264_v36 = vld [vmem:[%s1011_s6 + $0x68] sm:$0xff]  ;;  %v167_v56 = vsub.s32 0, %v166_v55 }
  0x1a   :  { %594 = vmatprep.subr.bf16.mxu0 %v593_v57  ;;  %617 = vmatprep.subr.bf16.mxu1 %v682_v11  ;;  %v633_v34 = vpack.c.bf16 %v262_v33, %v261_v32  ;;  %v636_v37 = vpack.c.bf16 %v264_v36, %v263_v35  ;;  %v265_v38 = vld [vmem:[%s1011_s6 + $0x70] sm:$0xff]  ;;  %v266_v39 = vld [vmem:[%s1011_s6 + $0x78] sm:$0xff]  ;;  %v250_v41 = vld [vmem:[%s1006_s1] sm:$0xff] }
  0x1b   :  { %v639_v40 = vpack.c.bf16 %v266_v39, %v265_v38  ;;  %v344_v42 = vld [vmem:[%s1013_s8] sm:$0xff]  ;;  %v345_v43 = vld [vmem:[%s1013_s8 + $0x8] sm:$0xff]  ;;  %v346_v44 = vld [vmem:[%s1013_s8 + $0x10] sm:$0xff] }
  0x1c   :  { %v642_v45 = vpack.c.bf16 %v345_v43, %v344_v42  ;;  %v347_v46 = vld [vmem:[%s1013_s8 + $0x18] sm:$0xff]  ;;  %v348_v48 = vld [vmem:[%s1013_s8 + $0x20] sm:$0xff]  ;;  %v349_v49 = vld [vmem:[%s1013_s8 + $0x28] sm:$0xff] }
  0x1d   :  { %596 = vmatpush3.bf16.msra.mxu0 %v595_v62  ;;  %v645_v47 = vpack.c.bf16 %v347_v46, %v346_v44  ;;  %v648_v50 = vpack.c.bf16 %v349_v49, %v348_v48  ;;  %v350_v51 = vld [vmem:[%s1013_s8 + $0x30] sm:$0xff]  ;;  %v351_v52 = vld [vmem:[%s1013_s8 + $0x38] sm:$0xff]  ;;  %v163_v57 = vld [vmem:[%s1010_s5] sm:$0x3] }
  0x1e   :  { %598 = vmatprep.subr.bf16.mxu0 %v597_v63  ;;  %v651_v53 = vpack.c.bf16 %v351_v52, %v350_v51  ;;  %v168_v59 = vrot.slane %v163_v57, %v167_v56  ;;  %v172_v60 = vrot.slane %v163_v57, %v171_v58  ;;  %v451_v1 = vld [vmem:[%s1012_s7] ss:$0 sm:$0xff] }
  0x1f   :  { %v452_v5 = vld [vmem:[%s1014_s9] ss:$0 sm:$0xff] }
  0x21   :  { %600 = vmatpush3.bf16.msra.mxu0 %v599_v2 }
  0x22   :  { %641 = vmatprep.subr.bf16.mxu0 %v682_v11 }
  0x24   :  { %142 = vmatmul.mubr.f32.vlgmr.msra.gmra.mrb[0].mxu0 %v36_v3 }
  0x25   :  { %566 = vmatprep.mubr.msk.f32.mxu0 %vm683_vm0, %v681_v10  ;;  %643 = vmatpush3.bf16.msra.mxu0 %v642_v45 }
  0x26   :  { %644 = vmatprep.subr.bf16.mxu0 %v682_v11 }
  0x29   :  { %646 = vmatpush3.bf16.msra.mxu0 %v645_v47 }
  0x2a   :  { %647 = vmatprep.subr.bf16.mxu0 %v682_v11 }
  0x2d   :  { %649 = vmatpush3.bf16.msra.mxu0 %v648_v50 }
  0x2e   :  { %650 = vmatprep.subr.bf16.mxu0 %v682_v11 }
  0x31   :  { %652 = vmatpush3.bf16.msra.mxu0 %v651_v53 }
  0xf7   :  { %v486_v12 = vpop.f32.mrb[0].mxu0 }
  0xf8   :  { %v487_v16 = vpop.f32.mrb[1].mxu0 }
  0xf9   :  { %v488_v17 = vadd.f32 %v487_v16, %v486_v12 }
  0xfb   :  { %v144_v19 = vadd.f32 %v488_v17, %v449_v15 }
  0xfd   :  { %450 = vmatmul.mubr.msk.f32.vlgmr.msra.gmra.mrb[0].mxu1 %vm175_vm1, %v144_v19 }
  0xfe   :  { %619 = vmatpush3.bf16.msra.mxu1 %v618_v18  ;;  %547 = vmatprep.mubr.msk.f32.mxu1 %vm683_vm0, %v681_v10 }
  0xff   :  { %620 = vmatprep.subr.bf16.mxu1 %v682_v11 }
 0x102   :  { %622 = vmatpush3.bf16.msra.mxu1 %v621_v22 }
 0x103   :  { %623 = vmatprep.subr.bf16.mxu1 %v682_v11 }
 0x106   :  { %625 = vmatpush3.bf16.msra.mxu1 %v624_v25 }
 0x107   :  { %626 = vmatprep.subr.bf16.mxu1 %v682_v11 }
 0x10a   :  { %628 = vmatpush3.bf16.msra.mxu1 %v627_v28 }
 0x10b   :  { %629 = vmatprep.subr.bf16.mxu1 %v682_v11 }
 0x10e   :  { %631 = vmatpush3.bf16.msra.mxu1 %v630_v31 }
 0x10f   :  { %632 = vmatprep.subr.bf16.mxu1 %v682_v11 }
 0x112   :  { %634 = vmatpush3.bf16.msra.mxu1 %v633_v34 }
 0x113   :  { %635 = vmatprep.subr.bf16.mxu1 %v682_v11 }
 0x116   :  { %637 = vmatpush3.bf16.msra.mxu1 %v636_v37 }
 0x117   :  { %638 = vmatprep.subr.bf16.mxu1 %v682_v11 }
 0x11a   :  { %640 = vmatpush3.bf16.msra.mxu1 %v639_v40 }
 0x11d   :  { %548 = vmatmul.mubr.f32.vlgmr.msra.gmra.mrb[2].mxu1 %v250_v41 }
 0x1d0   :  { %v245_v61 = vpop.f32.mrb[0].mxu1 }
 0x1d1   :  { %v246_v62 = vadd.f32 %v245_v61, %v168_v59  ;;  %v247_v63 = vpop.f32.mrb[1].mxu1 }
 0x1d2   :  { %v248_v0 = vadd.f32 %v247_v63, %v172_v60 }
 0x1d3   :  { %432 = vst [vmem:[#allocation2] sm:$0xff] %v246_v62 }
 0x1d4   :  { %433 = vst [vmem:[#allocation2 + $0x8] sm:$0xff] %v248_v0 }
 0x1f0   :  { %v340_v2 = vpop.f32.mrb[2].mxu1 }
 0x1f1   :  { %v341_v3 = vadd.f32 %v451_v1, %v340_v2  ;;  %v549_v4 = vpop.f32.mrb[3].mxu1 }
 0x1f3   :  { %567 = vmatmul.mubr.msk.f32.vlgmr.msra.gmra.mrb[2].mxu0 %vm175_vm1, %v341_v3 }
 0x2c6   :  { %v428_v6 = vpop.f32.mrb[2].mxu0 }
 0x2c7   :  { %v429_v7 = vadd.f32 %v452_v5, %v428_v6  ;;  %v568_v8 = vpop.f32.mrb[3].mxu0 }
 0x2c9   :  { %434 = vst [vmem:[#allocation2 + $0x10] sm:$0xff] %v429_v7 }
 0x2ca   :  { %668 = shalt.err (!%p665_p4)
}
 0x2cb   :  { %s669_s3 = scalar_lea.hbm %s1015_s10, 384 }
 0x2cc   :  { %p670_p5 = scmp.ne.s32.totalorder %s1015_s10, %s669_s3  ;;  %p673_p6 = scmp.lt.u32.totalorder %s669_s3, %s1015_s10 }
 0x2ce   :  { %p675_p7 = pnand %p673_p6, %p670_p5 }
 0x2d0   :  { %678 = shalt.err (!%p675_p7)
}
 0x2d1   :  { %444 = dma.vmem_to_hbm [thread:$0]  %s442_s17, 384, %s1015_s10, [#allocation3]  }
 0x2d2   :  { %679 = dma.done.wait [#allocation3], 384  }
 0x2d3   :  { %680 = vsyncadd [#allocation3], 4294966912 }
 0x2d4   :  { %448 = vsyncpa [#allocation3], 1 }

</bundles_post_ra>
